<compile_context>
chip_gen: v7x
topology: tpu7x:2x2x1
jax: 0.10.0
libtpu: 0.0.40
codegen_flags: <defaults>
</compile_context>

<pallas_src>
import functools

import jax
import jax.numpy as jnp
from jax import lax
from jax.experimental import pallas as pl
from jax.experimental.pallas import tpu as pltpu

# ---- module hyper-parameters (synthetic, deterministic) ---------------------
VOCAB = 64          # vocab_size
HIDDEN = 32         # hidden_dim
MAX_POS = 16        # max_position_embeddings
PAD_ID = 0          # pad_token_id (embedding row forced to zero, like padding_idx)
EPS = 1e-12         # layer_norm_eps


def decoder_embeddings_kernel(ids_ref, word_ref, pos_ref, gamma_ref, beta_ref,
                              out_ref, *, batch, seq):
    """Fused embedding gather + position add + LayerNorm (+ eval-mode dropout).

    ids_ref  : (B*S, 1) int32   token ids, flattened b-major
    word_ref : (V, H)   float32 word-embedding table (padding row pre-zeroed)
    pos_ref  : (P, H)   float32 position-embedding table
    gamma_ref: (1, H)   float32 LayerNorm scale
    beta_ref : (1, H)   float32 LayerNorm shift
    out_ref  : (B*S, H) float32
    """
    bs = batch * seq
    V, H = word_ref.shape

    # ---- batched one-hot gather on the MXU (vocab on the lane axis) ---------
    ids = ids_ref[...]                                         # (B*S, 1) int32
    iota_v = lax.broadcasted_iota(jnp.int32, (bs, V), 1)       # built once
    # Note: ids >= V would yield an all-zero row (zero embedding) instead of an
    # out-of-range gather fault; synthetic ids are always in range.
    onehot = (iota_v == ids).astype(jnp.bfloat16)              # (B*S, V), exact 0/1
    word_emb = jnp.dot(onehot, word_ref[...].astype(jnp.bfloat16),
                       preferred_element_type=jnp.float32)     # (B*S, H) f32

    # ---- position embeddings: rows 0..S-1, repeated across the batch --------
    pos_s = pos_ref[pl.ds(0, seq), :]                          # (S, H)
    pos_emb = jnp.concatenate([pos_s] * batch, axis=0)         # (B*S, H)

    emb = word_emb + pos_emb

    # ---- LayerNorm over hidden (biased variance, like torch.nn.LayerNorm) ---
    mean = jnp.mean(emb, axis=-1, keepdims=True)
    var = jnp.mean((emb - mean) ** 2, axis=-1, keepdims=True)
    normed = (emb - mean) * lax.rsqrt(var + EPS)
    y = normed * gamma_ref[...] + beta_ref[...]                # (B*S, H)

    # ---- dropout: identity in eval mode; single-shot store ------------------
    out_ref[...] = y


def decoder_embeddings(x, word_table, pos_table, gamma, beta):
    B, S = x.shape
    V, H = word_table.shape
    P = pos_table.shape[0]
    assert S <= P, "sequence length exceeds max_position_embeddings"

    ids = x.reshape(B * S, 1).astype(jnp.int32)   # flatten b-major (wrapper-side, free)

    kernel = functools.partial(decoder_embeddings_kernel, batch=B, seq=S)
    vmem = pltpu.MemorySpace.VMEM
    out2d = pl.pallas_call(
        kernel,
        out_shape=jax.ShapeDtypeStruct((B * S, H), jnp.float32),
        # No grid: total live data is ~14 KB, so everything is a full
        # VMEM-resident block and the kernel runs exactly once.
        in_specs=[
            pl.BlockSpec(memory_space=vmem),   # token ids (B*S, 1)
            pl.BlockSpec(memory_space=vmem),   # word embedding table
            pl.BlockSpec(memory_space=vmem),   # position embedding table
            pl.BlockSpec(memory_space=vmem),   # LayerNorm gamma
            pl.BlockSpec(memory_space=vmem),   # LayerNorm beta
        ],
        out_specs=pl.BlockSpec(memory_space=vmem),
    )(ids, word_table, pos_table, gamma, beta)
    return out2d.reshape(B, S, H)


def reference(x, word_table, pos_table, gamma, beta):
    # pure-JAX reference of the PyTorch forward (eval mode)
    we = word_table[x].astype(jnp.float32)      # (B, S, H)
    S = x.shape[1]
    pe = pos_table[:S][None, :, :]              # (1, S, H)
    emb = we + pe
    mean = emb.mean(-1, keepdims=True)
    var = ((emb - mean) ** 2).mean(-1, keepdims=True)
    normed = (emb - mean) / jnp.sqrt(var + EPS)
    return normed * gamma[0] + beta[0]


if __name__ == "__main__":
    key = jax.random.PRNGKey(0)
    k_x, k_w, k_p = jax.random.split(key, 3)

    B, S = 2, 8
    # token ids in [0, VOCAB); force a couple of pad tokens
    x = jax.random.randint(k_x, (B, S), 0, VOCAB, dtype=jnp.int32)
    x = x.at[0, -1].set(PAD_ID).at[1, -2].set(PAD_ID)

    # deterministic parameter init (synthetic)
    word_table = 0.02 * jax.random.normal(k_w, (VOCAB, HIDDEN), dtype=jnp.float32)
    word_table = word_table.at[PAD_ID].set(0.0)    # padding_idx row is zero
    pos_table = 0.02 * jax.random.normal(k_p, (MAX_POS, HIDDEN), dtype=jnp.float32)
    gamma = jnp.ones((1, HIDDEN), dtype=jnp.float32)
    beta = jnp.zeros((1, HIDDEN), dtype=jnp.float32)

    out = decoder_embeddings(x, word_table, pos_table, gamma, beta)
    out = jax.block_until_ready(out)
    assert out.shape == (B, S, HIDDEN)

    # (1) Tight check against a reference that uses the same bf16-rounded table:
    #     the one-hot MXU gather selects bf16 table rows exactly, so only
    #     LayerNorm arithmetic (rsqrt vs sqrt/div) differs.
    ref_bf16_table = reference(x, word_table.astype(jnp.bfloat16),
                               pos_table, gamma, beta)
    assert jnp.allclose(out, ref_bf16_table, atol=1e-4, rtol=1e-4), \
        "mismatch vs bf16-table reference"

    # (2) Loose check against the exact f32 module semantics: the only source of
    #     error is the bf16 cast of 0.02-scale weights, amplified ~1/std (~35x)
    #     by LayerNorm -> up to ~1e-2 on O(1) outputs.
    ref_f32 = reference(x, word_table, pos_table, gamma, beta)
    assert jnp.allclose(out, ref_f32, atol=2e-2, rtol=0.0), \
        "mismatch vs f32 reference"

    print("KERNEL_OK")
</pallas_src>

<mosaic_0001>
module attributes {stable_mosaic.version = 11 : i64} {
  func.func @decoder_embeddings_kernel(%arg0: memref<16x1xi32, #tpu.memory_space<vmem>>, %arg1: memref<64x32xf32, #tpu.memory_space<vmem>>, %arg2: memref<16x32xf32, #tpu.memory_space<vmem>>, %arg3: memref<1x32xf32, #tpu.memory_space<vmem>>, %arg4: memref<1x32xf32, #tpu.memory_space<vmem>>, %arg5: memref<16x32xf32, #tpu.memory_space<vmem>>) attributes {dimension_semantics = [], scalar_prefetch = 0 : i64, scratch_operands = 0 : i64, tpu.core_type = #tpu.core_type<tc>} {
    %c0 = arith.constant 0 : index
    %c0_0 = arith.constant 0 : index
    %0 = vector.load %arg0[%c0, %c0_0] : memref<16x1xi32, #tpu.memory_space<vmem>>, vector<16x1xi32>
    %1 = tpu.iota {dimensions = array<i32: 1>} : vector<16x64xi32>
    %2 = vector.broadcast %0 : vector<16x1xi32> to vector<16x64xi32>
    %3 = arith.cmpi eq, %1, %2 : vector<16x64xi32>
    %4 = arith.extui %3 : vector<16x64xi1> to vector<16x64xi32>
    %5 = arith.sitofp %4 : vector<16x64xi32> to vector<16x64xf32>
    %6 = arith.truncf %5 : vector<16x64xf32> to vector<16x64xbf16>
    %c0_1 = arith.constant 0 : index
    %c0_2 = arith.constant 0 : index
    %7 = vector.load %arg1[%c0_1, %c0_2] : memref<64x32xf32, #tpu.memory_space<vmem>>, vector<64x32xf32>
    %8 = arith.truncf %7 : vector<64x32xf32> to vector<64x32xbf16>
    %cst = arith.constant dense<0.000000e+00> : vector<16x32xf32>
    %9 = tpu.matmul %6, %8, %cst {dimension_numbers = #tpu.dot_dimension_numbers<[1], [0], [0], [1], [0, 0, 1, 1], [], []>} : vector<16x64xbf16>, vector<64x32xbf16>, vector<16x32xf32> -> vector<16x32xf32>
    %c0_3 = arith.constant 0 : index
    %c0_4 = arith.constant 0 : index
    %10 = vector.load %arg2[%c0_3, %c0_4] : memref<16x32xf32, #tpu.memory_space<vmem>>, vector<8x32xf32>
    %11 = tpu.concatenate %10, %10 in 0 : vector<8x32xf32>, vector<8x32xf32> -> vector<16x32xf32>
    %12 = arith.addf %9, %11 : vector<16x32xf32>
    %cst_5 = arith.constant dense<0.000000e+00> : vector<16xf32>
    %13 = vector.multi_reduction <add>, %12, %cst_5 [1] : vector<16x32xf32> to vector<16xf32>
    %14 = vector.shape_cast %13 : vector<16xf32> to vector<16x1xf32>
    %cst_6 = arith.constant 3.200000e+01 : f32
    %15 = vector.broadcast %cst_6 : f32 to vector<16x1xf32>
    %16 = arith.divf %14, %15 : vector<16x1xf32>
    %17 = vector.broadcast %16 : vector<16x1xf32> to vector<16x32xf32>
    %18 = arith.subf %12, %17 : vector<16x32xf32>
    %19 = arith.mulf %18, %18 : vector<16x32xf32>
    %cst_7 = arith.constant dense<0.000000e+00> : vector<16xf32>
    %20 = vector.multi_reduction <add>, %19, %cst_7 [1] : vector<16x32xf32> to vector<16xf32>
    %21 = vector.shape_cast %20 : vector<16xf32> to vector<16x1xf32>
    %cst_8 = arith.constant 3.200000e+01 : f32
    %22 = vector.broadcast %cst_8 : f32 to vector<16x1xf32>
    %23 = arith.divf %21, %22 : vector<16x1xf32>
    %24 = vector.broadcast %16 : vector<16x1xf32> to vector<16x32xf32>
    %25 = arith.subf %12, %24 : vector<16x32xf32>
    %cst_9 = arith.constant 9.99999996E-13 : f32
    %26 = vector.broadcast %cst_9 : f32 to vector<16x1xf32>
    %27 = arith.addf %23, %26 : vector<16x1xf32>
    %28 = math.rsqrt %27 : vector<16x1xf32>
    %29 = vector.broadcast %28 : vector<16x1xf32> to vector<16x32xf32>
    %30 = arith.mulf %25, %29 : vector<16x32xf32>
    %c0_10 = arith.constant 0 : index
    %c0_11 = arith.constant 0 : index
    %31 = vector.load %arg3[%c0_10, %c0_11] : memref<1x32xf32, #tpu.memory_space<vmem>>, vector<1x32xf32>
    %32 = vector.broadcast %31 : vector<1x32xf32> to vector<16x32xf32>
    %33 = arith.mulf %30, %32 : vector<16x32xf32>
    %c0_12 = arith.constant 0 : index
    %c0_13 = arith.constant 0 : index
    %34 = vector.load %arg4[%c0_12, %c0_13] : memref<1x32xf32, #tpu.memory_space<vmem>>, vector<1x32xf32>
    %35 = vector.broadcast %34 : vector<1x32xf32> to vector<16x32xf32>
    %36 = arith.addf %33, %35 : vector<16x32xf32>
    %c0_14 = arith.constant 0 : index
    %c0_15 = arith.constant 0 : index
    %37 = vector.load %arg5[%c0_14, %c0_15] : memref<16x32xf32, #tpu.memory_space<vmem>>, vector<16x32xf32>
    tpu.vector_store %arg5[%c0_14, %c0_15], %36 {strides = array<i32>} : memref<16x32xf32, #tpu.memory_space<vmem>>, vector<16x32xf32>,
    return
  }
}

</mosaic_0001>

<bundles_post_ra>
// kernel: tpu_custom_call.1
= control target key start
LH: loop header
LB: loop body
LE: loop exit
PB: predicated region body
PF: predicated region fallthrough
CT: control target
= control target key end

     0   :  { %v218_v2 = vmov 0   ;;  %v219_v3 = vmov 0.0   ;;  %s311_s0 = inlined_call_operand.vmem [shape: s32[16,1], index: 0, kind: input, shape index: {}]   ;;  %s312_s1 = inlined_call_operand.vmem [shape: f32[64,32], index: 1, kind: input, shape index: {}]   ;;  %s313_s2 = inlined_call_operand.vmem [shape: f32[16,32], index: 2, kind: input, shape index: {}]   ;;  %s314_s3 = inlined_call_operand.vmem [shape: f32[1,32], index: 3, kind: input, shape index: {}]   ;;  %s315_s4 = inlined_call_operand.vmem [shape: f32[1,32], index: 4, kind: input, shape index: {}]   ;;  %s316_s5 = inlined_call_operand.hbm [shape: f32[16,32], index: 5, kind: output, shape index: {}]  }
   0x1   :  { %v22_v0 = vld [vmem:[%s311_s0] sm:$0xff]  ;;  %189 = vset.pattern.permute.xlu0 %v218_v2  ;;  %171 = vmatprep.subr.bf16.mxu0 %v219_v3  ;;  %v40_v4 = vld [vmem:[%s312_s1 + $0x8] sm:$0xff]  ;;  %v41_v5 = vld [vmem:[%s312_s1 + $0x10] sm:$0xff] }
   0x2   :  { %v39_v1 = vld [vmem:[%s312_s1] sm:$0xff]  ;;  %v42_v6 = vld [vmem:[%s312_s1 + $0x18] sm:$0xff]  ;;  %27 = vperm.xlu0 %189, %v22_v0  }
   0x3   :  { %v47_v7 = vpack.c.bf16 %v40_v4, %v39_v1 }
   0x4   :  { %10 = vsyncpa [#allocation3], 0  ;;  %v23_v8 = vld [vmem:[%s311_s0 + $0x8] sm:$0xff]  ;;  %v48_v9 = vpack.c.bf16 %v42_v6, %v41_v5  ;;  %v43_v10 = vld [vmem:[%s312_s1 + $0x20] sm:$0xff]  ;;  %vm220_vm0 = vmmov 0   ;;  %v24_v16 = vlaneseq  ;;  %vm52_vm3 = vcmask 523264  }
   0x5   :  { %172 = vmatpush3.bf16.msra.mxu0 %v47_v7  ;;  %v44_v11 = vld [vmem:[%s312_s1 + $0x28] sm:$0xff]  ;;  %v45_v13 = vld [vmem:[%s312_s1 + $0x30] sm:$0xff]  ;;  %v46_v14 = vld [vmem:[%s312_s1 + $0x38] sm:$0xff]  ;;  %179 = vmatprep.mubr.msk.bf16.mxu0 %vm220_vm0, %v219_v3  ;;  %vm97_vm4 = vcmask 261120   ;;  %s221_s16 = smov [#allocation2]  }
   0x6   :  { %173 = vmatprep.subr.bf16.mxu0 %v219_v3  ;;  %30 = vperm.xlu0 %189, %v23_v8   ;;  %v49_v12 = vpack.c.bf16 %v44_v11, %v43_v10  ;;  %v50_v15 = vpack.c.bf16 %v46_v14, %v45_v13  ;;  %v25_v17 = vand.u32 127, %v24_v16  ;;  %v51_v23 = vld [vmem:[%s313_s2] sm:$0xff]  ;;  %s150_s17 = sshll.u32 %s221_s16, 4  ;;  %s151_s17 = int_to_ptr.vmem [resolvable:$true] %s150_s17 }
   0x7   :  { %v164_v49 = vld [vmem:[%s314_s3] ss:$0 sm:$0xff]  ;;  %s194_s18 = scalar_lea.vmem %s151_s17, 256  ;;  %p199_p1 = scmp.lt.s32.totalorder %s151_s17, %s151_s17 }
   0x8   :  { %v165_v51 = vld [vmem:[%s315_s4] ss:$0 sm:$0xff]  ;;  %p195_p0 = scmp.ne.s32.totalorder %s151_s17, %s194_s18  ;;  %p200_p2 = scmp.lt.s32.totalorder %s194_s18, %s194_s18 }
   0x9   :  { %174 = vmatpush3.bf16.msra.mxu0 %v48_v9 }
   0xa   :  { %175 = vmatprep.subr.bf16.mxu0 %v219_v3  ;;  %p201_p3 = por %p200_p2, %p199_p1 }
   0xc   :  { %p202_p4 = pnand %p201_p3, %p195_p0 }
   0xd   :  { %176 = vmatpush3.bf16.msra.mxu0 %v49_v12 }
   0xe   :  { %177 = vmatprep.subr.bf16.mxu0 %v219_v3 }
  0x11   :  { %178 = vmatpush3.bf16.msra.mxu0 %v50_v15 }
  0x81   :  { %v28_v18 = vpop.permute.xlu0 %27 }
  0x82   :  { %vm32_vm1 = vcmp.eq.s32.totalorder %v25_v17, %v28_v18 }
  0x83   :  { %v161_v20 = vsel %vm32_vm1, 1.0, %v219_v3 }
  0x85   :  { %v31_v19 = vpop.permute.xlu0 %30 }
  0x86   :  { %vm33_vm2 = vcmp.eq.s32.totalorder %v25_v17, %v31_v19 }
  0x87   :  { %v162_v21 = vsel %vm33_vm2, 1.0, %v219_v3 }
  0x88   :  { %v38_v22 = vpack.c.bf16 %v162_v21, %v161_v20 }
  0x8a   :  { %180 = vmatmul.mubr.msk.bf16.vlgmr.msra.gmra.mrb[0].mxu0 %vm52_vm3, %v38_v22 }
 0x15d   :  { %v90_v24 = vpop.f32.mrb[0].mxu0 }
 0x15e   :  { %v91_v25 = vadd.f32 %v90_v24, %v51_v23  ;;  %v181_v26 = vpop.f32.mrb[1].mxu0 }
 0x15f   :  { %v93_v27 = vpop.f32.mrb[2].mxu0 }
 0x160   :  { %v94_v28 = vadd.f32 %v93_v27, %v51_v23  ;;  %v182_v29 = vpop.f32.mrb[3].mxu0  ;;  %v98_v30 = vsel %vm97_vm4, %v91_v25, 0.0 }
 0x161   :  { %99 = vadd.xlane.f32.xlu1 %v98_v30 }
 0x162   :  { %v101_v31 = vsel %vm97_vm4, %v94_v28, 0.0 }
 0x165   :  { %102 = vadd.xlane.f32.xlu1 %v101_v31 }
 0x1ee   :  { %v100_v32 = vpop.xlane.xlu1 %99 }
 0x1ef   :  { %v105_v33 = vmul.f32 0.03125, %v100_v32 }
 0x1f1   :  { %v107_v34 = vsub.f32 %v91_v25, %v105_v33 }
 0x1f2   :  { %v103_v35 = vpop.xlane.xlu1 %102 }
 0x1f3   :  { %v106_v36 = vmul.f32 0.03125, %v103_v35  ;;  %v109_v37 = vmul.f32 %v107_v34, %v107_v34 }
 0x1f5   :  { %v108_v38 = vsub.f32 %v94_v28, %v106_v36  ;;  %v111_v39 = vsel %vm97_vm4, %v109_v37, 0.0 }
 0x1f6   :  { %112 = vadd.xlane.f32.xlu0 %v111_v39 }
 0x1f7   :  { %v110_v40 = vmul.f32 %v108_v38, %v108_v38 }
 0x1f9   :  { %v114_v41 = vsel %vm97_vm4, %v110_v40, 0.0 }
 0x1fa   :  { %115 = vadd.xlane.f32.xlu1 %v114_v41 }
 0x283   :  { %v113_v42 = vpop.xlane.xlu0 %112 }
 0x284   :  { %v117_v43 = vmul.f32 0.03125, %v113_v42 }
 0x286   :  { %v119_v44 = vadd.f32 1e-12, %v117_v43 }
 0x287   :  { %v116_v45 = vpop.xlane.xlu1 %115 }
 0x288   :  { %190 = vrsqrt.f32 %v119_v44  ;;  %v118_v46 = vmul.f32 0.03125, %v116_v45 }
 0x28a   :  { %v120_v47 = vadd.f32 1e-12, %v118_v46 }
 0x28c   :  { %192 = vrsqrt.f32 %v120_v47 }
 0x292   :  { %v191_v48 = vpop.eup %190 }
 0x293   :  { %v123_v50 = vmul.f32 %v191_v48, %v107_v34 }
 0x295   :  { %v132_v52 = vmul.f32 %v164_v49, %v123_v50 }
 0x296   :  { %v193_v53 = vpop.eup %192 }
 0x297   :  { %v124_v54 = vmul.f32 %v193_v53, %v108_v38  ;;  %v141_v55 = vadd.f32 %v165_v51, %v132_v52 }
 0x299   :  { %v133_v56 = vmul.f32 %v164_v49, %v124_v54  ;;  %143 = vst.msk [vmem:[#allocation2] sm:$0xff] %vm97_vm4, %v141_v55 }
 0x29b   :  { %v142_v57 = vadd.f32 %v165_v51, %v133_v56 }
 0x29d   :  { %144 = vst.msk [vmem:[#allocation2 + $0x8] sm:$0xff] %vm97_vm4, %v142_v57 }
 0x29e   :  { %205 = shalt.err (!%p202_p4)
}
 0x29f   :  { %s206_s19 = scalar_lea.hbm %s316_s5, 256 }
 0x2a0   :  { %p207_p5 = scmp.ne.s32.totalorder %s316_s5, %s206_s19  ;;  %p210_p6 = scmp.lt.u32.totalorder %s206_s19, %s316_s5 }
 0x2a2   :  { %p212_p7 = pnand %p210_p6, %p207_p5 }
 0x2a4   :  { %215 = shalt.err (!%p212_p7)
}
 0x2a5   :  { %s222_s24 = smov 128   ;;  %s223_s25 = smov 8  }
 0x2a6   :  { %156 = dma.vmem_to_hbm [thread:$0]  %s151_s17, 256, %s316_s5, [#allocation3], %s222_s24, %s222_s24, %s223_s25  }
 0x2a7   :  { %216 = dma.done.wait [#allocation3], 256  }
 0x2a8   :  { %217 = vsyncadd [#allocation3], 4294967040 }
 0x2a9   :  { %160 = vsyncpa [#allocation3], 1 }

</bundles_post_ra>
